<compile_context>
chip_gen: v6e
topology: v6e:2x2x1
jax: 0.10.0
libtpu: 0.0.40
codegen_flags: <defaults>
</compile_context>

<pallas_src>
import jax
import jax.numpy as jnp
from jax.experimental import pallas as pl
from jax.experimental.pallas import tpu as pltpu

_LANES = 128


def _round_up(n, m):
    return ((n + m - 1) // m) * m


def policy_net_kernel(x_ref, p_ref, out_ref):
    S = x_ref.shape[1]
    P, H = p_ref.shape
    A = P - S - 2          # slab rows: [ W1 (S) | b1 (1) | W2^T (A) | b2 (1) ]

    x = x_ref[...]                                    # (TB, S)
    w1 = p_ref[0:S, :]                                # (S, H)
    b1 = p_ref[S:S + 1, :]                            # (1, H)
    w2t = p_ref[S + 1:S + 1 + A, :]                   # (A, H)   lane-dense fc2 weight
    b2 = p_ref[S + 1 + A:S + 2 + A, :]                # (1, H)   first A lanes valid

    # fc1 + ReLU (MXU, f32 accumulation)
    h = jnp.dot(x, w1, preferred_element_type=jnp.float32) + b1
    h = jnp.maximum(h, 0.0)                           # (TB, H)

    # fc2: contract over H against the transposed (A, H) weight
    logits = jax.lax.dot_general(
        h, w2t, (((1,), (1,)), ((), ())),
        preferred_element_type=jnp.float32)           # (TB, A)
    logits = logits + b2[:, :A]

    # A == 2: softmax(logits)[:, 1] == sigmoid(l1 - l0) = 1 / (1 + exp(l0 - l1)).
    # Stays in VPU + EUP slots (exp + approx reciprocal); no XLU reductions.
    d = logits[:, 0:1] - logits[:, 1:2]               # (TB, 1)
    p1 = pl.reciprocal(1.0 + jnp.exp(d), approx=True)
    p0 = 1.0 - p1

    # Lane-dense store: scatter the two probabilities into a full 128-lane row.
    lane = jax.lax.broadcasted_iota(jnp.int32, out_ref.shape, 1)
    out = jnp.where(lane == 0, p0, jnp.where(lane == 1, p1, 0.0))
    out_ref[...] = out.astype(out_ref.dtype)


def pack_params(w1, b1, w2, b2):
    """Pack [W1 | b1 | W2^T | b2 (zero-padded to H lanes)] into one f32 slab."""
    S, H = w1.shape
    A = w2.shape[1]
    b1 = jnp.reshape(b1, (1, H)).astype(jnp.float32)
    b2 = jnp.reshape(b2, (1, A)).astype(jnp.float32)
    b2_row = jnp.zeros((1, H), jnp.float32).at[:, :A].set(b2)
    return jnp.concatenate(
        [w1.astype(jnp.float32), b1, jnp.transpose(w2).astype(jnp.float32), b2_row],
        axis=0)                                        # (S + A + 2, H)


def policy_net_forward(x, w1, b1, w2, b2, *, block_b=128):
    B, S = x.shape
    H = w1.shape[1]
    A = w2.shape[1]
    assert A == 2, "kernel specializes the 2-action (CartPole) softmax"

    params = pack_params(w1, b1, w2, b2)               # (S + A + 2, H)
    P = params.shape[0]

    # Batch tiling: one block if small, otherwise 128-row blocks sharded across
    # TensorCores (v7x) via the parallel grid axis. Pad B so blocks divide evenly.
    tb = min(block_b, _round_up(B, 8))
    b_pad = _round_up(B, tb)
    if b_pad != B:
        x = jnp.pad(x, ((0, b_pad - B), (0, 0)))

    out = pl.pallas_call(
        policy_net_kernel,
        out_shape=jax.ShapeDtypeStruct((b_pad, _LANES), jnp.float32),
        grid=(b_pad // tb,),
        in_specs=[
            pl.BlockSpec((tb, S), lambda i: (i, 0)),    # batch-blocked activations
            pl.BlockSpec((P, H), lambda i: (0, 0)),     # params stay VMEM-resident
        ],
        out_specs=pl.BlockSpec((tb, _LANES), lambda i: (i, 0)),  # lane-dense output
        compiler_params=pltpu.CompilerParams(
            dimension_semantics=("parallel",)),
    )(x, params)
    return out[:B, :A]


def init_params(key, state_dim, hidden_dim, action_dim):
    # Deterministic init mimicking torch.nn.Linear's U(-1/sqrt(fan_in), 1/sqrt(fan_in)).
    k1, k2, k3, k4 = jax.random.split(key, 4)
    bound1 = 1.0 / jnp.sqrt(state_dim)
    bound2 = 1.0 / jnp.sqrt(hidden_dim)
    w1 = jax.random.uniform(k1, (state_dim, hidden_dim), jnp.float32, -bound1, bound1)
    b1 = jax.random.uniform(k2, (1, hidden_dim), jnp.float32, -bound1, bound1)
    w2 = jax.random.uniform(k3, (hidden_dim, action_dim), jnp.float32, -bound2, bound2)
    b2 = jax.random.uniform(k4, (1, action_dim), jnp.float32, -bound2, bound2)
    return w1, b1, w2, b2


if __name__ == "__main__":
    # CartPole-v1: state_dim=4, action_dim=2; module uses hidden_dim=128.
    # Batch of vectorized env states (amortizes dispatch/DMA; exercises a 2-step
    # parallel batch grid) while staying tiny in absolute size (~4 KB of states).
    state_dim, hidden_dim, action_dim = 4, 128, 2
    batch = 256

    key = jax.random.PRNGKey(0)
    k_x, k_p = jax.random.split(key)
    x = jax.random.normal(k_x, (batch, state_dim), dtype=jnp.float32)
    w1, b1, w2, b2 = init_params(k_p, state_dim, hidden_dim, action_dim)

    probs = jax.jit(policy_net_forward)(x, w1, b1, w2, b2)
    probs = jax.block_until_ready(probs)

    # Pure-JAX reference of the same math.
    h_ref = jnp.maximum(x @ w1 + b1, 0.0)
    ref = jax.nn.softmax(h_ref @ w2 + b2, axis=1)
    assert probs.shape == (batch, action_dim)
    # approx reciprocal (EUP vrcp) => slightly looser tolerance than exact softmax
    assert jnp.allclose(probs, ref, atol=2e-3, rtol=2e-3)
    assert jnp.allclose(jnp.sum(probs, axis=1), 1.0, atol=1e-5)

    print("KERNEL_OK")
</pallas_src>

<mosaic_0001>
module attributes {stable_mosaic.version = 11 : i64} {
  func.func @policy_net_kernel(%arg0: i32, %arg1: memref<128x4xf32, #tpu.memory_space<vmem>>, %arg2: memref<8x128xf32, #tpu.memory_space<vmem>>, %arg3: memref<128x128xf32, #tpu.memory_space<vmem>>) attributes {dimension_semantics = [#tpu.dimension_semantics<parallel>], iteration_bounds = array<i64: 2>, scalar_prefetch = 0 : i64, scratch_operands = 0 : i64, tpu.core_type = #tpu.core_type<tc>, window_params = [{transform_indices = @transform_0, window_bounds = array<i64: 128, 4>}, {pipeline_mode = #tpu.pipeline_mode<synchronous>, transform_indices = @transform_1, window_bounds = array<i64: 8, 128>}, {transform_indices = @transform_2, window_bounds = array<i64: 128, 128>}]} {
    %c0 = arith.constant 0 : index
    %c0_0 = arith.constant 0 : index
    %0 = vector.load %arg1[%c0, %c0_0] : memref<128x4xf32, #tpu.memory_space<vmem>>, vector<128x4xf32>
    %c0_1 = arith.constant 0 : index
    %c0_2 = arith.constant 0 : index
    %1 = vector.load %arg2[%c0_1, %c0_2] : memref<8x128xf32, #tpu.memory_space<vmem>>, vector<4x128xf32>
    %c4 = arith.constant 4 : index
    %c0_3 = arith.constant 0 : index
    %2 = vector.load %arg2[%c4, %c0_3] : memref<8x128xf32, #tpu.memory_space<vmem>>, vector<1x128xf32>
    %c5 = arith.constant 5 : index
    %c0_4 = arith.constant 0 : index
    %3 = vector.load %arg2[%c5, %c0_4] : memref<8x128xf32, #tpu.memory_space<vmem>>, vector<2x128xf32>
    %c7 = arith.constant 7 : index
    %c0_5 = arith.constant 0 : index
    %4 = vector.load %arg2[%c7, %c0_5] : memref<8x128xf32, #tpu.memory_space<vmem>>, vector<1x128xf32>
    %cst = arith.constant dense<0.000000e+00> : vector<128x128xf32>
    %5 = tpu.matmul %0, %1, %cst {dimension_numbers = #tpu.dot_dimension_numbers<[1], [0], [0], [1], [0, 0, 1, 1], [], []>} : vector<128x4xf32>, vector<4x128xf32>, vector<128x128xf32> -> vector<128x128xf32>
    %6 = vector.broadcast %2 : vector<1x128xf32> to vector<128x128xf32>
    %7 = arith.addf %5, %6 : vector<128x128xf32>
    %cst_6 = arith.constant 0.000000e+00 : f32
    %8 = vector.broadcast %cst_6 : f32 to vector<128x128xf32>
    %9 = arith.maximumf %7, %8 : vector<128x128xf32>
    %cst_7 = arith.constant dense<0.000000e+00> : vector<128x2xf32>
    %10 = tpu.matmul %9, %3, %cst_7 {dimension_numbers = #tpu.dot_dimension_numbers<[1], [1], [0], [0], [0, 0, 1, 0], [], []>} : vector<128x128xf32>, vector<2x128xf32>, vector<128x2xf32> -> vector<128x2xf32>
    %11 = vector.extract_strided_slice %4 {offsets = [0, 0], sizes = [1, 2], strides = [1, 1]} : vector<1x128xf32> to vector<1x2xf32>
    %12 = vector.broadcast %11 : vector<1x2xf32> to vector<128x2xf32>
    %13 = arith.addf %10, %12 : vector<128x2xf32>
    %14 = vector.extract_strided_slice %13 {offsets = [0, 0], sizes = [128, 1], strides = [1, 1]} : vector<128x2xf32> to vector<128x1xf32>
    %15 = vector.extract_strided_slice %13 {offsets = [0, 1], sizes = [128, 1], strides = [1, 1]} : vector<128x2xf32> to vector<128x1xf32>
    %16 = arith.subf %14, %15 : vector<128x1xf32>
    %17 = math.exp %16 : vector<128x1xf32>
    %cst_8 = arith.constant 1.000000e+00 : f32
    %18 = vector.broadcast %cst_8 : f32 to vector<128x1xf32>
    %19 = arith.addf %18, %17 : vector<128x1xf32>
    %20 = tpu.reciprocal %19 {approx = true} : vector<128x1xf32> -> vector<128x1xf32>
    %cst_9 = arith.constant 1.000000e+00 : f32
    %21 = vector.broadcast %cst_9 : f32 to vector<128x1xf32>
    %22 = arith.subf %21, %20 : vector<128x1xf32>
    %23 = tpu.iota {dimensions = array<i32: 1>} : vector<128x128xi32>
    %c0_i32 = arith.constant 0 : i32
    %24 = vector.broadcast %c0_i32 : i32 to vector<128x128xi32>
    %25 = arith.cmpi eq, %23, %24 : vector<128x128xi32>
    %c1_i32 = arith.constant 1 : i32
    %26 = vector.broadcast %c1_i32 : i32 to vector<128x128xi32>
    %27 = arith.cmpi eq, %23, %26 : vector<128x128xi32>
    %cst_10 = arith.constant 0.000000e+00 : f32
    %28 = vector.shape_cast %20 : vector<128x1xf32> to vector<128x1xf32>
    %29 = vector.broadcast %28 : vector<128x1xf32> to vector<128x128xf32>
    %30 = vector.broadcast %cst_10 : f32 to vector<128x128xf32>
    %31 = arith.select %27, %29, %30 : vector<128x128xi1>, vector<128x128xf32>
    %32 = vector.shape_cast %22 : vector<128x1xf32> to vector<128x1xf32>
    %33 = vector.broadcast %32 : vector<128x1xf32> to vector<128x128xf32>
    %34 = arith.select %25, %33, %31 : vector<128x128xi1>, vector<128x128xf32>
    %c0_11 = arith.constant 0 : index
    %c0_12 = arith.constant 0 : index
    %35 = vector.load %arg3[%c0_11, %c0_12] : memref<128x128xf32, #tpu.memory_space<vmem>>, vector<128x128xf32>
    tpu.vector_store %arg3[%c0_11, %c0_12], %34 {strides = array<i32>} : memref<128x128xf32, #tpu.memory_space<vmem>>, vector<128x128xf32>,
    return
  }
  func.func @transform_0(%arg0: i32) -> (i32, i32) {
    %c0_i32 = arith.constant 0 : i32
    %c0_i32_0 = arith.constant 0 : i32
    return %arg0, %c0_i32 : i32, i32
  }
  func.func @transform_1(%arg0: i32) -> (i32, i32) {
    %c0_i32 = arith.constant 0 : i32
    %c0_i32_0 = arith.constant 0 : i32
    %c0_i32_1 = arith.constant 0 : i32
    return %c0_i32, %c0_i32_0 : i32, i32
  }
  func.func @transform_2(%arg0: i32) -> (i32, i32) {
    %c0_i32 = arith.constant 0 : i32
    %c0_i32_0 = arith.constant 0 : i32
    return %arg0, %c0_i32 : i32, i32
  }
}

</mosaic_0001>

<bundles_post_ra>
// kernel: policy_net_forward.1
= control target key start
LH: loop header
LB: loop body
LE: loop exit
PB: predicated region body
PF: predicated region fallthrough
CT: control target
= control target key end

     0   :  { %s1179_s9 = smov 0   ;;  %s1391_s0 = inlined_call_operand.vmem [shape: f32[256,4], index: 0, kind: input, shape index: {}]   ;;  %s1392_s1 = inlined_call_operand.vmem [shape: f32[8,128], index: 1, kind: input, shape index: {}]   ;;  %s1393_s2 = inlined_call_operand.vmem [shape: f32[256,128], index: 2, kind: output, shape index: {}]  }
   0x1 LB: > { %s962_s10 = sadd.s32 4294967295, %s1160_s9   ;;  %p966_p0 = scmp.ge.s32.totalorder %s1160_s9, 1  ;;  %s1160_s9 = sphi %s1179_s9, %s12_s9  }
   0x2   : > { %p113_p1 = scmp.lt.s32.totalorder %s1160_s9, 3 }
   0x4   : > { %p114_p2 = pnand %p966_p0, %p113_p1 }
   0x5   : > { %s967_s13 = sshll.u32 (!%p114_p2), %s962_s10, 4  ;;  %s1162_s24 = smov (!%p114_p2), 127  }
   0x6   : > { %117 = sbr.rel (%p114_p2) target bundleno = 750 (0x2ee), region = 28  ;;  %p136_p3 = scmp.lt.s32.totalorder (!%p114_p2), %s967_s13, 31 }
   0xb   : > { %v163_v0 = vld [vmem:[%s1392_s1] sm:$0xf]  ;;  %vm220_vm0 = vcmask 1043456   ;;  %s1395_s13 = smov (!%p136_p3, %s967_s13), 31  ;;  %vm171_vm1 = vcmask 31744  }
   0xc   : > { %1026 = vmatprep.subr.msk.mxu0 %vm220_vm0, %v163_v0  ;;  %s968_s14 = sshll.u32 %s1395_s13, 3  ;;  %v165_v17 = vld [vmem:[%s1392_s1 + $0x5] sm:$0x3]  ;;  %v971_v18 = vld [vmem:[%s1392_s1 + $0x4] ss:$0 sm:$0xff] }
   0xd   : > { %1027 = vmatpush3.msk.msra.mxu0 %vm220_vm0, %v163_v0  ;;  %s1198_s17 = scalar_lea.vmem %s1391_s0, %s968_s14  ;;  %1052 = vmatprep.subr.mxu1 %v165_v17  ;;  %s1306_s27 = scalar_lea.vmem %s1393_s2, %s968_s14 }
   0xe   : > { %v147_v1 = vld [vmem:[%s1198_s17] sm:$0xff]  ;;  %v148_v2 = vld [vmem:[%s1198_s17 + $0x8] sm:$0xff]  ;;  %v149_v3 = vld [vmem:[%s1198_s17 + $0x10] sm:$0xff]  ;;  %1053 = vmatpush3.xpose.msra.mxu1 %v165_v17 }
   0xf   : > { %1028 = vmatprep.mubr.msk.f32.mxu0 %vm171_vm1, %v147_v1  ;;  %v150_v4 = vld [vmem:[%s1198_s17 + $0x18] sm:$0xff]  ;;  %v151_v5 = vld [vmem:[%s1198_s17 + $0x20] sm:$0xff]  ;;  %v152_v6 = vld [vmem:[%s1198_s17 + $0x28] sm:$0xff] }
  0x10   : > { %1029 = vmatmul.mubr.msk.f32.vlgmr.msra.gmra.mxu0 %vm171_vm1, %v148_v2  ;;  %v153_v7 = vld [vmem:[%s1198_s17 + $0x30] sm:$0xff]  ;;  %v154_v8 = vld [vmem:[%s1198_s17 + $0x38] sm:$0xff]  ;;  %v155_v9 = vld [vmem:[%s1198_s17 + $0x40] sm:$0xff] }
  0x11   : > { %1031 = vmatprep.mubr.msk.f32.mxu0 %vm171_vm1, %v149_v3  ;;  %v156_v10 = vld [vmem:[%s1198_s17 + $0x48] sm:$0xff]  ;;  %v157_v11 = vld [vmem:[%s1198_s17 + $0x50] sm:$0xff]  ;;  %v158_v12 = vld [vmem:[%s1198_s17 + $0x58] sm:$0xff] }
  0x12   : > { %v159_v13 = vld [vmem:[%s1198_s17 + $0x60] sm:$0xff]  ;;  %v160_v14 = vld [vmem:[%s1198_s17 + $0x68] sm:$0xff]  ;;  %v161_v15 = vld [vmem:[%s1198_s17 + $0x70] sm:$0xff] }
  0x13   : > { %v162_v16 = vld [vmem:[%s1198_s17 + $0x78] sm:$0xff]  ;;  %v989_v3 = vld [vmem:[%s1392_s1 + $0x7] ss:$0 sm:$0xff] }
  0x14   : > { %1032 = vmatmul.mubr.msk.f32.gmra.mxu0 %vm171_vm1, %v150_v4 }
  0x15   : > { %1034 = vmatprep.mubr.msk.f32.mxu0 %vm171_vm1, %v151_v5 }
  0x18   : > { %1035 = vmatmul.mubr.msk.f32.gmra.mxu0 %vm171_vm1, %v152_v6 }
  0x19   : > { %1037 = vmatprep.mubr.msk.f32.mxu0 %vm171_vm1, %v153_v7 }
  0x1c   : > { %1038 = vmatmul.mubr.msk.f32.gmra.mxu0 %vm171_vm1, %v154_v8 }
  0x1d   : > { %1040 = vmatprep.mubr.msk.f32.mxu0 %vm171_vm1, %v155_v9 }
  0x20   : > { %1041 = vmatmul.mubr.msk.f32.gmra.mxu0 %vm171_vm1, %v156_v10 }
  0x21   : > { %1043 = vmatprep.mubr.msk.f32.mxu0 %vm171_vm1, %v157_v11 }
  0x24   : > { %1044 = vmatmul.mubr.msk.f32.gmra.mxu0 %vm171_vm1, %v158_v12 }
  0x25   : > { %1046 = vmatprep.mubr.msk.f32.mxu0 %vm171_vm1, %v159_v13 }
  0x28   : > { %1047 = vmatmul.mubr.msk.f32.gmra.mxu0 %vm171_vm1, %v160_v14 }
  0x29   : > { %1049 = vmatprep.mubr.msk.f32.mxu0 %vm171_vm1, %v161_v15 }
  0x2c   : > { %1050 = vmatmul.mubr.msk.f32.gmra.mxu0 %vm171_vm1, %v162_v16 }
  0xd0   : > { %v1030_v19 = vpop.f32.mrf.mxu0 }
  0xd1   : > { %v296_v20 = vadd.f32 %v1030_v19, %v971_v18 }
  0xd2   : > { %v290_v21 = vpop.f32.mrf.mxu0 }
  0xd3   : > { %v291_v22 = vadd.f32 %v971_v18, %v290_v21  ;;  %v370_v26 = vmax.f32 %v296_v20, 0.0 }
  0xd4   : > { %v1033_v23 = vpop.f32.mrf.mxu0 }
  0xd5   : > { %v306_v24 = vadd.f32 %v1033_v23, %v971_v18  ;;  %v369_v25 = vmax.f32 %v291_v22, 0.0 }
  0xd6   : > { %v300_v27 = vpop.f32.mrf.mxu0 }
  0xd7   : > { %v301_v28 = vadd.f32 %v971_v18, %v300_v27  ;;  %1054 = vmatprep.mubr.f32.mxu1 %v369_v25  ;;  %v372_v29 = vmax.f32 %v306_v24, 0.0 }
  0xd8   : > { %v1036_v30 = vpop.f32.mrf.mxu0  ;;  %1055 = vmatmul.mubr.f32.vlgmr.msra.gmra.mxu1 %v370_v26 }
  0xd9   : > { %v371_v31 = vmax.f32 %v301_v28, 0.0  ;;  %v316_v32 = vadd.f32 %v1036_v30, %v971_v18 }
  0xda   : > { %v310_v33 = vpop.f32.mrf.mxu0 }
  0xdb   : > { %v311_v34 = vadd.f32 %v971_v18, %v310_v33  ;;  %1057 = vmatprep.mubr.f32.mxu1 %v371_v31  ;;  %v374_v35 = vmax.f32 %v316_v32, 0.0 }
  0xdc   : > { %v1039_v36 = vpop.f32.mrf.mxu0  ;;  %1058 = vmatmul.mubr.f32.gmra.mxu1 %v372_v29  ;;  %v1163_v29 = vmov 0  }
  0xdd   : > { %v373_v37 = vmax.f32 %v311_v34, 0.0  ;;  %v326_v38 = vadd.f32 %v1039_v36, %v971_v18  ;;  %1088 = vset.pattern.permute.xlu1 %v1163_v29  ;;  %1089 = vset.pattern.permute.xlu0 %v1163_v29 }
  0xde   : > { %v320_v39 = vpop.f32.mrf.mxu0 }
  0xdf   : > { %v321_v40 = vadd.f32 %v971_v18, %v320_v39  ;;  %1060 = vmatprep.mubr.f32.mxu1 %v373_v37  ;;  %v376_v41 = vmax.f32 %v326_v38, 0.0 }
  0xe0   : > { %v1042_v42 = vpop.f32.mrf.mxu0  ;;  %1061 = vmatmul.mubr.f32.gmra.mxu1 %v374_v35 }
  0xe1   : > { %v375_v43 = vmax.f32 %v321_v40, 0.0  ;;  %v336_v44 = vadd.f32 %v1042_v42, %v971_v18 }
  0xe2   : > { %v330_v45 = vpop.f32.mrf.mxu0 }
  0xe3   : > { %v331_v46 = vadd.f32 %v971_v18, %v330_v45  ;;  %1063 = vmatprep.mubr.f32.mxu1 %v375_v43  ;;  %v378_v47 = vmax.f32 %v336_v44, 0.0 }
  0xe4   : > { %v1045_v48 = vpop.f32.mrf.mxu0  ;;  %1064 = vmatmul.mubr.f32.gmra.mxu1 %v376_v41 }
  0xe5   : > { %v377_v49 = vmax.f32 %v331_v46, 0.0  ;;  %v346_v50 = vadd.f32 %v1045_v48, %v971_v18 }
  0xe6   : > { %v340_v51 = vpop.f32.mrf.mxu0 }
  0xe7   : > { %v341_v52 = vadd.f32 %v971_v18, %v340_v51  ;;  %1066 = vmatprep.mubr.f32.mxu1 %v377_v49  ;;  %v380_v53 = vmax.f32 %v346_v50, 0.0 }
  0xe8   : > { %v1048_v54 = vpop.f32.mrf.mxu0  ;;  %1067 = vmatmul.mubr.f32.gmra.mxu1 %v378_v47 }
  0xe9   : > { %v379_v55 = vmax.f32 %v341_v52, 0.0  ;;  %v356_v56 = vadd.f32 %v1048_v54, %v971_v18 }
  0xea   : > { %v350_v57 = vpop.f32.mrf.mxu0 }
  0xeb   : > { %v351_v58 = vadd.f32 %v971_v18, %v350_v57  ;;  %1069 = vmatprep.mubr.f32.mxu1 %v379_v55  ;;  %v382_v59 = vmax.f32 %v356_v56, 0.0 }
  0xec   : > { %v1051_v60 = vpop.f32.mrf.mxu0  ;;  %1070 = vmatmul.mubr.f32.gmra.mxu1 %v380_v53 }
  0xed   : > { %v381_v61 = vmax.f32 %v351_v58, 0.0  ;;  %v366_v62 = vadd.f32 %v1051_v60, %v971_v18 }
  0xee   : > { %v360_v63 = vpop.f32.mrf.mxu0 }
  0xef   : > { %v361_v0 = vadd.f32 %v971_v18, %v360_v63  ;;  %1072 = vmatprep.mubr.f32.mxu1 %v381_v61  ;;  %v384_v1 = vmax.f32 %v366_v62, 0.0 }
  0xf0   : > { %1073 = vmatmul.mubr.f32.gmra.mxu1 %v382_v59 }
  0xf1   : > { %v383_v2 = vmax.f32 %v361_v0, 0.0 }
  0xf3   : > { %1075 = vmatprep.mubr.f32.mxu1 %v383_v2 }
  0xf4   : > { %1076 = vmatmul.mubr.f32.gmra.mxu1 %v384_v1 }
 0x198   : > { %v1056_v4 = vpop.f32.mrf.mxu1 }
 0x199   : > { %v461_v5 = vadd.f32 %v1056_v4, %v989_v3 }
 0x19a   : > { %v455_v6 = vpop.f32.mrf.mxu1 }
 0x19b   : > { %552 = vrot.lane.b32.xlu0 %v461_v5, %s1162_s24  ;;  %v456_v8 = vadd.f32 %v989_v3, %v455_v6 }
 0x19c   : > { %v1059_v7 = vpop.f32.mrf.mxu1 }
 0x19d   : > { %v471_v9 = vadd.f32 %v1059_v7, %v989_v3 }
 0x19e   : > { %v465_v10 = vpop.f32.mrf.mxu1 }
 0x19f   : > { %556 = vrot.lane.b32.xlu1 %v471_v9, %s1162_s24  ;;  %550 = vrot.lane.b32.xlu0 %v456_v8, %s1162_s24  ;;  %v466_v12 = vadd.f32 %v989_v3, %v465_v10 }
 0x1a0   : > { %v1062_v11 = vpop.f32.mrf.mxu1 }
 0x1a1   : > { %v481_v14 = vadd.f32 %v1062_v11, %v989_v3 }
 0x1a2   : > { %v475_v13 = vpop.f32.mrf.mxu1 }
 0x1a3   : > { %v476_v15 = vadd.f32 %v989_v3, %v475_v13  ;;  %554 = vrot.lane.b32.xlu1 %v466_v12, %s1162_s24 }
 0x1a4   : > { %v1065_v16 = vpop.f32.mrf.mxu1 }
 0x1a5   : > { %558 = vrot.lane.b32.xlu0 %v476_v15, %s1162_s24  ;;  %v1246_v18 = vadd.f32 %v1065_v16, %v989_v3 }
 0x1a6   : > { %v485_v17 = vpop.f32.mrf.mxu1 }
 0x1a7   : > { %v1248_v19 = vadd.f32 %v989_v3, %v485_v17  ;;  %560 = vrot.lane.b32.xlu1 %v481_v14, %s1162_s24 }
 0x1a8   : > { %v1068_v20 = vpop.f32.mrf.mxu1 }
 0x1a9   : > { %562 = vrot.lane.b32.xlu0 %v1248_v19, %s1162_s24  ;;  %v1253_v22 = vadd.f32 %v1068_v20, %v989_v3 }
 0x1aa   : > { %v495_v21 = vpop.f32.mrf.mxu1 }
 0x1ab   : > { %v1255_v23 = vadd.f32 %v989_v3, %v495_v21  ;;  %564 = vrot.lane.b32.xlu1 %v1246_v18, %s1162_s24 }
 0x1ac   : > { %v1071_v24 = vpop.f32.mrf.mxu1 }
 0x1ad   : > { %566 = vrot.lane.b32.xlu0 %v1255_v23, %s1162_s24  ;;  %v1261_v26 = vadd.f32 %v1071_v24, %v989_v3 }
 0x1ae   : > { %v505_v25 = vpop.f32.mrf.mxu1 }
 0x1af   : > { %v1263_v27 = vadd.f32 %v989_v3, %v505_v25  ;;  %568 = vrot.lane.b32.xlu1 %v1253_v22, %s1162_s24 }
 0x1b0   : > { %v1074_v28 = vpop.f32.mrf.mxu1 }
 0x1b1   : > { %570 = vrot.lane.b32.xlu0 %v1263_v27, %s1162_s24  ;;  %v1269_v31 = vadd.f32 %v1074_v28, %v989_v3 }
 0x1b2   : > { %v515_v30 = vpop.f32.mrf.mxu1 }
 0x1b3   : > { %v1271_v32 = vadd.f32 %v989_v3, %v515_v30  ;;  %572 = vrot.lane.b32.xlu1 %v1261_v26, %s1162_s24 }
 0x1b4   : > { %v1077_v33 = vpop.f32.mrf.mxu1 }
 0x1b5   : > { %574 = vrot.lane.b32.xlu0 %v1271_v32, %s1162_s24  ;;  %v1277_v35 = vadd.f32 %v1077_v33, %v989_v3 }
 0x1b6   : > { %v525_v34 = vpop.f32.mrf.mxu1 }
 0x1b7   : > { %v1279_v36 = vadd.f32 %v989_v3, %v525_v34  ;;  %576 = vrot.lane.b32.xlu1 %v1269_v31, %s1162_s24 }
 0x1b9   : > { %578 = vrot.lane.b32.xlu0 %v1279_v36, %s1162_s24 }
 0x1bb   : > { %580 = vrot.lane.b32.xlu1 %v1277_v35, %s1162_s24 }
 0x20d   : > { %v553_v37 = vpop.permute.xlu0 %552 }
 0x20e   : > { %v599_v38 = vsub.f32 %v461_v5, %v553_v37 }
 0x210   : > { %v616_v39 = vmul.f32 1.442695, %v599_v38 }
 0x211   : > { %v557_v40 = vpop.permute.xlu1 %556  ;;  %v551_v41 = vpop.permute.xlu0 %550 }
 0x212   : > { %1090 = vpow2.f32 %v616_v39  ;;  %v598_v42 = vsub.f32 %v456_v8, %v551_v41  ;;  %v601_v43 = vsub.f32 %v471_v9, %v557_v40 }
 0x214   : > { %v614_v44 = vmul.f32 1.442695, %v598_v42  ;;  %v620_v47 = vmul.f32 1.442695, %v601_v43 }
 0x215   : > { %v555_v45 = vpop.permute.xlu1 %554 }
 0x216   : > { %v600_v46 = vsub.f32 %v466_v12, %v555_v45  ;;  %1092 = vpow2.f32 %v614_v44 }
 0x217   : > { %v559_v48 = vpop.permute.xlu0 %558 }
 0x218   : > { %v618_v49 = vmul.f32 1.442695, %v600_v46  ;;  %v602_v50 = vsub.f32 %v476_v15, %v559_v48 }
 0x219   : > { %v561_v51 = vpop.permute.xlu1 %560 }
 0x21a   : > { %1094 = vpow2.f32 %v618_v49  ;;  %v603_v52 = vsub.f32 %v481_v14, %v561_v51  ;;  %v622_v53 = vmul.f32 1.442695, %v602_v50 }
 0x21b   : > { %1096 = vpow2.f32 %v620_v47  ;;  %v563_v54 = vpop.permute.xlu0 %562 }
 0x21c   : > { %v624_v56 = vmul.f32 1.442695, %v603_v52  ;;  %1098 = vpow2.f32 %v622_v53  ;;  %v604_v59 = vsub.f32 %v1248_v19, %v563_v54 }
 0x21d   : > { %v565_v58 = vpop.permute.xlu1 %564 }
 0x21e   : > { %v605_v60 = vsub.f32 %v1246_v18, %v565_v58  ;;  %v626_v63 = vmul.f32 1.442695, %v604_v59 }
 0x21f   : > { %v1091_v55 = vpop.eup %1090  ;;  %v567_v0 = vpop.permute.xlu0 %566 }
 0x220   : > { %v647_v57 = vadd.f32 1.0, %v1091_v55  ;;  %v628_v2 = vmul.f32 1.442695, %v605_v60  ;;  %v606_v6 = vsub.f32 %v1255_v23, %v567_v0 }
 0x221   : > { %v569_v4 = vpop.permute.xlu1 %568 }
 0x222   : > { %1100 = vrcp.f32 %v647_v57  ;;  %v607_v8 = vsub.f32 %v1253_v22, %v569_v4  ;;  %v630_v9 = vmul.f32 1.442695, %v606_v6 }
 0x223   : > { %1102 = vpow2.f32 %v624_v56  ;;  %v1093_v61 = vpop.eup %1092  ;;  %v571_v11 = vpop.permute.xlu0 %570 }
 0x224   : > { %v646_v62 = vadd.f32 1.0, %v1093_v61  ;;  %v632_v13 = vmul.f32 1.442695, %v607_v8  ;;  %v608_v17 = vsub.f32 %v1263_v27, %v571_v11 }
 0x225   : > { %v573_v15 = vpop.permute.xlu1 %572 }
 0x226   : > { %1104 = vrcp.f32 %v646_v62  ;;  %v609_v19 = vsub.f32 %v1261_v26, %v573_v15  ;;  %v634_v21 = vmul.f32 1.442695, %v608_v17 }
 0x227   : > { %v1095_v1 = vpop.eup %1094  ;;  %1106 = vpow2.f32 %v626_v63  ;;  %v575_v24 = vpop.permute.xlu0 %574 }
 0x228   : > { %v1097_v3 = vpop.eup %1096  ;;  %v648_v5 = vadd.f32 1.0, %v1095_v1  ;;  %1108 = vpow2.f32 %v628_v2  ;;  %v636_v25 = vmul.f32 1.442695, %v609_v19  ;;  %v610_v27 = vsub.f32 %v1271_v32, %v575_v24 }
 0x229   : > { %v649_v7 = vadd.f32 1.0, %v1097_v3  ;;  %v1099_v10 = vpop.eup %1098  ;;  %v577_v30 = vpop.permute.xlu1 %576 }
 0x22a   : > { %1110 = vrcp.f32 %v648_v5  ;;  %v650_v16 = vadd.f32 1.0, %v1099_v10  ;;  %v611_v37 = vsub.f32 %v1269_v31, %v577_v30  ;;  %v638_v39 = vmul.f32 1.442695, %v610_v27 }
 0x22b   : > { %1112 = vrcp.f32 %v649_v7  ;;  %v579_v42 = vpop.permute.xlu0 %578 }
 0x22c   : > { %1114 = vpow2.f32 %v630_v9  ;;  %v640_v43 = vmul.f32 1.442695, %v611_v37  ;;  %v612_v47 = vsub.f32 %v1279_v36, %v579_v42 }
 0x22d   : > { %1116 = vpow2.f32 %v632_v13  ;;  %v581_v32 = vpop.permute.xlu1 %580 }
 0x22e   : > { %1118 = vrcp.f32 %v650_v16  ;;  %v613_v49 = vsub.f32 %v1277_v35, %v581_v32  ;;  %v642_v51 = vmul.f32 1.442695, %v612_v47 }
 0x22f   : > { %v1101_v12 = vpop.eup %1100 }
 0x230   : > { %v1103_v14 = vpop.eup %1102  ;;  %705 = vperm.xlu1 %1088, %v1101_v12   ;;  %v679_v28 = vsub.f32 1.0, %v1101_v12  ;;  %v644_v54 = vmul.f32 1.442695, %v613_v49 }
 0x231   : > { %v651_v18 = vadd.f32 1.0, %v1103_v14 }
 0x233   : > { %v1105_v20 = vpop.eup %1104  ;;  %1120 = vrcp.f32 %v651_v18 }
 0x234   : > { %700 = vperm.xlu0 %1089, %v1105_v20   ;;  %v678_v22 = vsub.f32 1.0, %v1105_v20  ;;  %v1107_v23 = vpop.eup %1106  ;;  %1122 = vpow2.f32 %v634_v21  ;;  %v694_v21 = vlaneseq }
 0x235   : > { %v1109_v29 = vpop.eup %1108  ;;  %v652_v33 = vadd.f32 1.0, %v1107_v23  ;;  %1124 = vpow2.f32 %v636_v25 }
 0x236   : > { %796 = vperm.xlu1 %1088, %v678_v22   ;;  %v653_v26 = vadd.f32 1.0, %v1109_v29  ;;  %v1297_v22 = vand.u32 127, %v694_v21 }
 0x237   : > { %v1111_v34 = vpop.eup %1110  ;;  %1126 = vrcp.f32 %v652_v33 }
 0x238   : > { %801 = vperm.xlu0 %1089, %v679_v28   ;;  %v1113_v38 = vpop.eup %1112  ;;  %v680_v40 = vsub.f32 1.0, %v1111_v34  ;;  %1128 = vrcp.f32 %v653_v26  ;;  %vm697_vm2 = vcmp.eq.s32.totalorder %v1297_v22, 1  ;;  %vm696_vm3 = vcmp.eq.s32.totalorder %v1297_v22, 0 }
 0x239   : > { %v1115_v41 = vpop.eup %1114  ;;  %v681_v44 = vsub.f32 1.0, %v1113_v38  ;;  %1130 = vpow2.f32 %v638_v39 }
 0x23a   : > { %710 = vperm.xlu1 %1088, %v1111_v34   ;;  %v1117_v45 = vpop.eup %1116  ;;  %v654_v46 = vadd.f32 1.0, %v1115_v41  ;;  %1132 = vpow2.f32 %v640_v43 }
 0x23b   : > { %v1119_v31 = vpop.eup %1118  ;;  %v655_v48 = vadd.f32 1.0, %v1117_v45 }
 0x23c   : > { %715 = vperm.xlu0 %1089, %v1113_v38   ;;  %1134 = vrcp.f32 %v654_v46  ;;  %v682_v52 = vsub.f32 1.0, %v1119_v31 }
 0x23d   : > { %1136 = vrcp.f32 %v655_v48 }
 0x23e   : > { %806 = vperm.xlu1 %1088, %v680_v40   ;;  %1138 = vpow2.f32 %v642_v51 }
 0x23f   : > { %1140 = vpow2.f32 %v644_v54 }
 0x240   : > { %811 = vperm.xlu0 %1089, %v681_v44   ;;  %v1121_v50 = vpop.eup %1120 }
 0x241   : > { %v1123_v53 = vpop.eup %1122  ;;  %v683_v55 = vsub.f32 1.0, %v1121_v50 }
 0x242   : > { %720 = vperm.xlu1 %1088, %v1119_v31   ;;  %v1125_v56 = vpop.eup %1124  ;;  %v656_v57 = vadd.f32 1.0, %v1123_v53 }
 0x243   : > { %v657_v58 = vadd.f32 1.0, %v1125_v56 }
 0x244   : > { %725 = vperm.xlu0 %1089, %v1121_v50   ;;  %v1127_v36 = vpop.eup %1126  ;;  %1142 = vrcp.f32 %v656_v57 }
 0x245   : > { %v1129_v35 = vpop.eup %1128  ;;  %v684_v59 = vsub.f32 1.0, %v1127_v36  ;;  %1144 = vrcp.f32 %v657_v58 }
 0x246   : > { %816 = vperm.xlu1 %1088, %v682_v52   ;;  %v1131_v60 = vpop.eup %1130  ;;  %v685_v61 = vsub.f32 1.0, %v1129_v35 }
 0x247   : > { %v1133_v62 = vpop.eup %1132  ;;  %v658_v63 = vadd.f32 1.0, %v1131_v60 }
 0x248   : > { %821 = vperm.xlu0 %1089, %v683_v55   ;;  %v659_v1 = vadd.f32 1.0, %v1133_v62 }
 0x249   : > { %v1135_v0 = vpop.eup %1134  ;;  %1146 = vrcp.f32 %v658_v63 }
 0x24a   : > { %730 = vperm.xlu1 %1088, %v1127_v36   ;;  %v1137_v2 = vpop.eup %1136  ;;  %v686_v3 = vsub.f32 1.0, %v1135_v0  ;;  %1148 = vrcp.f32 %v659_v1 }
 0x24b   : > { %v1139_v4 = vpop.eup %1138  ;;  %v687_v5 = vsub.f32 1.0, %v1137_v2 }
 0x24c   : > { %735 = vperm.xlu0 %1089, %v1129_v35   ;;  %v1141_v6 = vpop.eup %1140  ;;  %v660_v7 = vadd.f32 1.0, %v1139_v4 }
 0x24d   : > { %v661_v9 = vadd.f32 1.0, %v1141_v6 }
 0x24e   : > { %826 = vperm.xlu1 %1088, %v684_v59   ;;  %1150 = vrcp.f32 %v660_v7 }
 0x24f   : > { %1152 = vrcp.f32 %v661_v9 }
 0x250   : > { %831 = vperm.xlu0 %1089, %v685_v61  }
 0x251   : > { %v1143_v8 = vpop.eup %1142 }
 0x252   : > { %740 = vperm.xlu1 %1088, %v1135_v0   ;;  %v1145_v10 = vpop.eup %1144  ;;  %v688_v11 = vsub.f32 1.0, %v1143_v8 }
 0x253   : > { %v689_v12 = vsub.f32 1.0, %v1145_v10 }
 0x254   : > { %745 = vperm.xlu0 %1089, %v1137_v2  }
 0x256   : > { %836 = vperm.xlu1 %1088, %v686_v3   ;;  %v1147_v13 = vpop.eup %1146 }
 0x257   : > { %v1149_v14 = vpop.eup %1148  ;;  %v690_v15 = vsub.f32 1.0, %v1147_v13 }
 0x258   : > { %841 = vperm.xlu0 %1089, %v687_v5   ;;  %v691_v16 = vsub.f32 1.0, %v1149_v14 }
 0x25a   : > { %750 = vperm.xlu1 %1088, %v1143_v8  }
 0x25b   : > { %v1151_v17 = vpop.eup %1150 }
 0x25c   : > { %755 = vperm.xlu0 %1089, %v1145_v10   ;;  %v1153_v18 = vpop.eup %1152  ;;  %v692_v19 = vsub.f32 1.0, %v1151_v17 }
 0x25d   : > { %v693_v20 = vsub.f32 1.0, %v1153_v18 }
 0x25e   : > { %846 = vperm.xlu1 %1088, %v688_v11  }
 0x260   : > { %851 = vperm.xlu0 %1089, %v689_v12  }
 0x262   : > { %760 = vperm.xlu1 %1088, %v1147_v13  }
 0x264   : > { %765 = vperm.xlu0 %1089, %v1149_v14  }
 0x266   : > { %856 = vperm.xlu1 %1088, %v690_v15  }
 0x268   : > { %861 = vperm.xlu0 %1089, %v691_v16  }
 0x26a   : > { %770 = vperm.xlu1 %1088, %v1151_v17  }
 0x26c   : > { %775 = vperm.xlu0 %1089, %v1153_v18  }
 0x26e   : > { %866 = vperm.xlu1 %1088, %v692_v19  }
 0x270   : > { %871 = vperm.xlu0 %1089, %v693_v20  }
 0x2ab   : > { %v706_v23 = vpop.permute.xlu1 %705 }
 0x2ac   : > { %v779_v30 = vsel %vm697_vm2, %v706_v23, 0.0 }
 0x2af   : > { %v701_v24 = vpop.permute.xlu0 %700 }
 0x2b0   : > { %v778_v25 = vsel %vm697_vm2, %v701_v24, 0.0 }
 0x2b1   : > { %v797_v28 = vpop.permute.xlu1 %796 }
 0x2b2   : > { %v874_v29 = vsel %vm696_vm3, %v797_v28, %v778_v25 }
 0x2b3   : > { %890 = vst [vmem:[%s1306_s27] sm:$0xff] %v874_v29  ;;  %v802_v33 = vpop.permute.xlu0 %801 }
 0x2b4   : > { %v875_v27 = vsel %vm696_vm3, %v802_v33, %v779_v30 }
 0x2b5   : > { %891 = vst [vmem:[%s1306_s27 + $0x8] sm:$0xff] %v875_v27  ;;  %v711_v34 = vpop.permute.xlu1 %710 }
 0x2b6   : > { %v780_v37 = vsel %vm697_vm2, %v711_v34, 0.0 }
 0x2b7   : > { %v716_v26 = vpop.permute.xlu0 %715 }
 0x2b8   : > { %v781_v40 = vsel %vm697_vm2, %v716_v26, 0.0 }
 0x2b9   : > { %v807_v38 = vpop.permute.xlu1 %806 }
 0x2ba   : > { %v876_v39 = vsel %vm696_vm3, %v807_v38, %v780_v37 }
 0x2bb   : > { %892 = vst [vmem:[%s1306_s27 + $0x10] sm:$0xff] %v876_v39  ;;  %v812_v41 = vpop.permute.xlu0 %811 }
 0x2bc   : > { %v877_v42 = vsel %vm696_vm3, %v812_v41, %v781_v40 }
 0x2bd   : > { %893 = vst [vmem:[%s1306_s27 + $0x18] sm:$0xff] %v877_v42  ;;  %v721_v43 = vpop.permute.xlu1 %720 }
 0x2be   : > { %v782_v45 = vsel %vm697_vm2, %v721_v43, 0.0 }
 0x2bf   : > { %v726_v44 = vpop.permute.xlu0 %725 }
 0x2c0   : > { %v783_v47 = vsel %vm697_vm2, %v726_v44, 0.0 }
 0x2c1   : > { %v817_v32 = vpop.permute.xlu1 %816 }
 0x2c2   : > { %v878_v46 = vsel %vm696_vm3, %v817_v32, %v782_v45 }
 0x2c3   : > { %894 = vst [vmem:[%s1306_s27 + $0x20] sm:$0xff] %v878_v46  ;;  %v822_v31 = vpop.permute.xlu0 %821 }
 0x2c4   : > { %v879_v48 = vsel %vm696_vm3, %v822_v31, %v783_v47 }
 0x2c5   : > { %895 = vst [vmem:[%s1306_s27 + $0x28] sm:$0xff] %v879_v48  ;;  %v731_v49 = vpop.permute.xlu1 %730 }
 0x2c6   : > { %v784_v51 = vsel %vm697_vm2, %v731_v49, 0.0 }
 0x2c7   : > { %v736_v50 = vpop.permute.xlu0 %735 }
 0x2c8   : > { %v785_v54 = vsel %vm697_vm2, %v736_v50, 0.0 }
 0x2c9   : > { %v827_v52 = vpop.permute.xlu1 %826 }
 0x2ca   : > { %v880_v53 = vsel %vm696_vm3, %v827_v52, %v784_v51 }
 0x2cb   : > { %896 = vst [vmem:[%s1306_s27 + $0x30] sm:$0xff] %v880_v53  ;;  %v832_v55 = vpop.permute.xlu0 %831 }
 0x2cc   : > { %v881_v56 = vsel %vm696_vm3, %v832_v55, %v785_v54 }
 0x2cd   : > { %897 = vst [vmem:[%s1306_s27 + $0x38] sm:$0xff] %v881_v56  ;;  %v741_v57 = vpop.permute.xlu1 %740 }
 0x2ce   : > { %v786_v58 = vsel %vm697_vm2, %v741_v57, 0.0 }
 0x2cf   : > { %v746_v36 = vpop.permute.xlu0 %745 }
 0x2d0   : > { %v787_v60 = vsel %vm697_vm2, %v746_v36, 0.0 }
 0x2d1   : > { %v837_v35 = vpop.permute.xlu1 %836 }
 0x2d2   : > { %v882_v59 = vsel %vm696_vm3, %v837_v35, %v786_v58 }
 0x2d3   : > { %898 = vst [vmem:[%s1306_s27 + $0x40] sm:$0xff] %v882_v59  ;;  %v842_v61 = vpop.permute.xlu0 %841 }
 0x2d4   : > { %v883_v62 = vsel %vm696_vm3, %v842_v61, %v787_v60 }
 0x2d5   : > { %899 = vst [vmem:[%s1306_s27 + $0x48] sm:$0xff] %v883_v62  ;;  %v751_v63 = vpop.permute.xlu1 %750 }
 0x2d6   : > { %v788_v1 = vsel %vm697_vm2, %v751_v63, 0.0 }
 0x2d7   : > { %v756_v0 = vpop.permute.xlu0 %755 }
 0x2d8   : > { %v789_v4 = vsel %vm697_vm2, %v756_v0, 0.0 }
 0x2d9   : > { %v847_v2 = vpop.permute.xlu1 %846 }
 0x2da   : > { %v884_v3 = vsel %vm696_vm3, %v847_v2, %v788_v1 }
 0x2db   : > { %900 = vst [vmem:[%s1306_s27 + $0x50] sm:$0xff] %v884_v3  ;;  %v852_v5 = vpop.permute.xlu0 %851 }
 0x2dc   : > { %v885_v6 = vsel %vm696_vm3, %v852_v5, %v789_v4 }
 0x2dd   : > { %901 = vst [vmem:[%s1306_s27 + $0x58] sm:$0xff] %v885_v6  ;;  %v761_v7 = vpop.permute.xlu1 %760 }
 0x2de   : > { %v790_v9 = vsel %vm697_vm2, %v761_v7, 0.0 }
 0x2df   : > { %v766_v8 = vpop.permute.xlu0 %765 }
 0x2e0   : > { %v791_v12 = vsel %vm697_vm2, %v766_v8, 0.0 }
 0x2e1   : > { %v857_v10 = vpop.permute.xlu1 %856 }
 0x2e2   : > { %v886_v11 = vsel %vm696_vm3, %v857_v10, %v790_v9 }
 0x2e3   : > { %902 = vst [vmem:[%s1306_s27 + $0x60] sm:$0xff] %v886_v11  ;;  %v862_v13 = vpop.permute.xlu0 %861 }
 0x2e4   : > { %v887_v14 = vsel %vm696_vm3, %v862_v13, %v791_v12 }
 0x2e5   : > { %903 = vst [vmem:[%s1306_s27 + $0x68] sm:$0xff] %v887_v14  ;;  %v771_v15 = vpop.permute.xlu1 %770 }
 0x2e6   : > { %v792_v17 = vsel %vm697_vm2, %v771_v15, 0.0 }
 0x2e7   : > { %v776_v16 = vpop.permute.xlu0 %775 }
 0x2e8   : > { %v793_v20 = vsel %vm697_vm2, %v776_v16, 0.0 }
 0x2e9   : > { %v867_v18 = vpop.permute.xlu1 %866 }
 0x2ea   : > { %v888_v19 = vsel %vm696_vm3, %v867_v18, %v792_v17 }
 0x2eb   : > { %904 = vst [vmem:[%s1306_s27 + $0x70] sm:$0xff] %v888_v19  ;;  %v872_v21 = vpop.permute.xlu0 %871 }
 0x2ec   : > { %v889_v23 = vsel %vm696_vm3, %v872_v21, %v793_v20 }
 0x2ed   : > { %905 = vst [vmem:[%s1306_s27 + $0x78] sm:$0xff] %v889_v23 }
 0x2ee PF: > { %s12_s9 = sadd.s32 1, %s1160_s9  }
 0x2ef   : > { %p9_p4 = scmp.ge.s32.totalorder %s12_s9, 4  }
 0x2f1   :  { %11 = sbr.rel (!%p9_p4) target bundleno = 1 (0x1), region = 58 }

</bundles_post_ra>
